<compile_context>
chip_gen: v7x
topology: tpu7x:2x2x1
jax: 0.10.0
libtpu: 0.0.40
codegen_flags: <defaults>
</compile_context>

<pallas_src>
import functools

import jax
import jax.numpy as jnp
from jax.experimental import pallas as pl
from jax.experimental.pallas import tpu as pltpu

NUM_KERNEL, DIM_KERNEL = 100, 5
HEAD_TK = 512                                              # K-tile of flat dim
HEAD_NOUT = ((NUM_KERNEL * DIM_KERNEL + 1 + 127) // 128) * 128   # 512 lanes
CONV_TL_MAX = 512                                          # output-length tile
CONV_HALO = 8                                              # >= (K-1)//2 for K<=9
NEG_SLOPE = 0.2


def _round_up(x, m):
    return (x + m - 1) // m * m


def _mosaic_params(semantics, block_bytes):
    # Generation-aware-ish scoped-VMEM budget: enough headroom for the
    # double-buffered tiles, capped well under v7x's 64 MiB physical VMEM.
    vlim = int(min(max(4 * block_bytes + (2 << 20), 16 << 20), 48 << 20))
    return pltpu.CompilerParams(dimension_semantics=semantics,
                                vmem_limit_bytes=vlim)


# ---------------------------------------------------------------------------
# Pallas kernels
# ---------------------------------------------------------------------------
def _dense_kernel(x_ref, w_ref, b_ref, o_ref, *, neg_slope):
    y = jnp.dot(x_ref[...], w_ref[...], preferred_element_type=jnp.float32)
    y = y + b_ref[...]
    if neg_slope is not None:
        y = jnp.where(y >= 0.0, y, neg_slope * y)
    o_ref[...] = y.astype(o_ref.dtype)


def dense(x, w, b, *, neg_slope=None, out_dtype=jnp.float32, tm=512):
    """out = act(x @ w + b); x: (M,K), w: (K,N), b: (1,N). M-tiled grid."""
    M, K = x.shape
    N = w.shape[1]
    if M <= tm:
        tm_eff, Mp = M, M
    else:
        tm_eff = tm
        Mp = _round_up(M, tm_eff)
        if Mp != M:
            x = jnp.pad(x, ((0, Mp - M), (0, 0)))
    block_bytes = (tm_eff * K + K * N + N + tm_eff * N) * 4
    out = pl.pallas_call(
        functools.partial(_dense_kernel, neg_slope=neg_slope),
        out_shape=jax.ShapeDtypeStruct((Mp, N), out_dtype),
        grid=(Mp // tm_eff,),
        in_specs=[pl.BlockSpec((tm_eff, K), lambda i: (i, 0)),
                  pl.BlockSpec((K, N), lambda i: (0, 0)),
                  pl.BlockSpec((1, N), lambda i: (0, 0))],
        out_specs=pl.BlockSpec((tm_eff, N), lambda i: (i, 0)),
        compiler_params=_mosaic_params(("parallel",), block_bytes),
    )(x, w, b)
    return out[:M] if Mp != M else out


def _conv_kernel(xe_ref, xo_ref, w_ref, b_ref, o_ref, *, K, neg):
    """Fused stride-2 Conv1d + bias + LeakyReLU on one (batch, L-tile) block.

    xe_ref/xo_ref: (TL + HALO, C_in) bf16 even/odd-phase input slabs
    w_ref:         (K, C_in, C_out)  bf16 (tap-major)
    b_ref:         (1, C_out)        f32
    o_ref:         (TL, C_out)       bf16
    """
    tl, c_out = o_ref.shape
    acc = jnp.zeros((tl, c_out), jnp.float32)
    for k in range(K):                            # static unroll, K in {5,7,9}
        src_ref = xe_ref if (k % 2 == 0) else xo_ref
        off = k // 2
        xk = src_ref[pl.ds(off, tl), :]            # unit-stride slab window
        acc = acc + jnp.dot(xk, w_ref[k], preferred_element_type=jnp.float32)
    y = acc + b_ref[...]
    y = jnp.where(y >= 0.0, y, neg * y)
    o_ref[...] = y.astype(o_ref.dtype)


def conv1d_lrelu(x, w_t, b, *, pad, stride=2, neg=NEG_SLOPE):
    """x: (B, L, C_in) bf16; w_t: (K, C_in, C_out) bf16; b: (1, C_out) f32."""
    assert stride == 2, "phase-split conv kernel assumes stride 2"
    B, L, C_in = x.shape
    K, _, C_out = w_t.shape
    L_out = (L + 2 * pad - K) // stride + 1
    tl = min(CONV_TL_MAX, _round_up(L_out, 16))
    L_out_pad = _round_up(L_out, tl)
    n_tiles = L_out_pad // tl

    # Zero-pad, split into even/odd phases (stride-2 -> unit-stride reads),
    # then cut overlapping (tl + HALO)-row slabs per output tile.  This keeps
    # only a small halo (not a Kx im2col matrix) in HBM.
    lph = L_out_pad + CONV_HALO
    lp = 2 * lph
    x_pad = jnp.pad(x, ((0, 0), (pad, lp - L - pad), (0, 0)))
    x_even = x_pad[:, 0::2, :]                    # (B, lph, C_in)
    x_odd = x_pad[:, 1::2, :]
    row_idx = (jnp.arange(n_tiles)[:, None] * tl
               + jnp.arange(tl + CONV_HALO)[None, :])        # (n_tiles, tl+HALO)
    xe_t = x_even[:, row_idx, :]                  # (B, n_tiles, tl+HALO, C_in)
    xo_t = x_odd[:, row_idx, :]

    block_bytes = (2 * (tl + CONV_HALO) * C_in * 2
                   + K * C_in * C_out * 2 + C_out * 4 + tl * C_out * 2)
    kern = functools.partial(_conv_kernel, K=K, neg=neg)
    y = pl.pallas_call(
        kern,
        out_shape=jax.ShapeDtypeStruct((B, L_out_pad, C_out), jnp.bfloat16),
        grid=(B, n_tiles),
        in_specs=[
            pl.BlockSpec((None, None, tl + CONV_HALO, C_in),
                         lambda bb, i: (bb, i, 0, 0)),
            pl.BlockSpec((None, None, tl + CONV_HALO, C_in),
                         lambda bb, i: (bb, i, 0, 0)),
            pl.BlockSpec((K, C_in, C_out), lambda bb, i: (0, 0, 0)),
            pl.BlockSpec((1, C_out), lambda bb, i: (0, 0)),
        ],
        out_specs=pl.BlockSpec((None, tl, C_out), lambda bb, i: (bb, i, 0)),
        compiler_params=_mosaic_params(("parallel", "parallel"), block_bytes),
    )(xe_t, xo_t, w_t, b)
    return y[:, :L_out, :]


def _head_kernel(x_ref, w_ref, g_ref, sa_ref, sb_ref, ss_ref, cond_ref,
                 wf_ref, wc_ref, b_ref, o_ref, acc_ref, *, nk, dk):
    """K-tiled (x @ [w_mb | w_x]) accumulation + MBD + final Linear."""
    k = pl.program_id(0)

    @pl.when(k == 0)
    def _():
        acc_ref[...] = jnp.zeros_like(acc_ref)

    acc_ref[...] += jnp.dot(x_ref[...], w_ref[...],
                            preferred_element_type=jnp.float32)

    @pl.when(k == pl.num_programs(0) - 1)
    def _():
        acc = acc_ref[...]                              # (B, HEAD_NOUT) f32
        act = acc[:, :nk * dk]                          # (B, nk*dk)
        xw = acc[:, nk * dk:nk * dk + 1]                # (B, 1)  = x @ w_x
        # batched pairwise L1 over dim_kernel groups, all 2-D ops:
        a_rep = jnp.dot(sa_ref[...], act, preferred_element_type=jnp.float32)
        b_til = jnp.dot(sb_ref[...], act, preferred_element_type=jnp.float32)
        l1 = jnp.dot(jnp.abs(a_rep - b_til), g_ref[...],
                     preferred_element_type=jnp.float32)          # (B*B, nk)
        feats = jnp.dot(ss_ref[...], jnp.exp(-l1),
                        preferred_element_type=jnp.float32)       # (B, nk)
        out = (xw
               + jnp.dot(feats, wf_ref[...], preferred_element_type=jnp.float32)
               + jnp.dot(cond_ref[...], wc_ref[...],
                         preferred_element_type=jnp.float32)
               + b_ref[...])
        o_ref[...] = out.astype(o_ref.dtype)


def mb_discrim_and_fc(x, w_head, group, cond, w_f, w_c, b, tk):
    """x: (B, flat_pad) bf16, w_head: (flat_pad, HEAD_NOUT) bf16 -> (B, 1) f32."""
    B, flat_pad = x.shape
    n_k = flat_pad // tk
    eye = jnp.eye(B, dtype=jnp.float32)
    sel_a = jnp.repeat(eye, B, axis=0)            # (B*B, B): row r -> i = r // B
    sel_b = jnp.tile(eye, (B, 1))                 # (B*B, B): row r -> j = r %  B
    sel_s = sel_a.T                               # (B, B*B): sum over j
    block_bytes = (B * tk * 2 + tk * HEAD_NOUT * 2 + group.size * 4
                   + 3 * B * B * B * 4 + cond.size * 4 + w_f.size * 4
                   + w_c.size * 4 + 4 + B * HEAD_NOUT * 4 + B * 4)
    kern = functools.partial(_head_kernel, nk=NUM_KERNEL, dk=DIM_KERNEL)
    return pl.pallas_call(
        kern,
        out_shape=jax.ShapeDtypeStruct((B, 1), jnp.float32),
        grid=(n_k,),
        in_specs=[
            pl.BlockSpec((B, tk), lambda k: (0, k)),
            pl.BlockSpec((tk, HEAD_NOUT), lambda k: (k, 0)),
            pl.BlockSpec(group.shape, lambda k: (0, 0)),
            pl.BlockSpec(sel_a.shape, lambda k: (0, 0)),
            pl.BlockSpec(sel_b.shape, lambda k: (0, 0)),
            pl.BlockSpec(sel_s.shape, lambda k: (0, 0)),
            pl.BlockSpec(cond.shape, lambda k: (0, 0)),
            pl.BlockSpec(w_f.shape, lambda k: (0, 0)),
            pl.BlockSpec(w_c.shape, lambda k: (0, 0)),
            pl.BlockSpec(b.shape, lambda k: (0, 0)),
        ],
        out_specs=pl.BlockSpec((B, 1), lambda k: (0, 0)),
        scratch_shapes=[pltpu.VMEM((B, HEAD_NOUT), jnp.float32)],
        compiler_params=_mosaic_params(("arbitrary",), block_bytes),
    )(x, w_head, group, sel_a, sel_b, sel_s, cond, w_f, w_c, b)


# ---------------------------------------------------------------------------
# Glue (plain JAX): spectral norm, embedding lookup  (parameter preprocessing)
# ---------------------------------------------------------------------------
def spectral_normalize(w, key, n_iter=1):
    # TODO(synk): PyTorch spectral_norm keeps a persistent `u` buffer across
    # steps; here a fresh power iteration is run at init (preprocessing only).
    w2d = w.reshape(w.shape[0], -1)
    u = jax.random.normal(key, (w2d.shape[0],), jnp.float32)
    u = u / (jnp.linalg.norm(u) + 1e-12)
    v = w2d.T @ u
    for _ in range(n_iter):
        v = w2d.T @ u
        v = v / (jnp.linalg.norm(v) + 1e-12)
        u = w2d @ v
        u = u / (jnp.linalg.norm(u) + 1e-12)
    sigma = u @ (w2d @ v)
    return w / sigma


# ---------------------------------------------------------------------------
# Parameters & forward
# ---------------------------------------------------------------------------
def init_params(key, ecg_length, n_leads, condition_dim):
    keys = jax.random.split(key, 16)

    def unif(k, shape, fan_in):
        bound = 1.0 / float(fan_in) ** 0.5
        return jax.random.uniform(k, shape, jnp.float32, -bound, bound)

    p = {}
    w1 = spectral_normalize(unif(keys[0], (64, n_leads, 5), n_leads * 5), keys[12])
    w2 = spectral_normalize(unif(keys[2], (128, 64, 7), 64 * 7), keys[13])
    w3 = spectral_normalize(unif(keys[4], (256, 128, 9), 128 * 9), keys[14])
    # tap-major / channels-last conv weights, bf16 MXU operands
    p["w1"] = jnp.transpose(w1, (2, 1, 0)).astype(jnp.bfloat16)   # (K, C_in, C_out)
    p["w2"] = jnp.transpose(w2, (2, 1, 0)).astype(jnp.bfloat16)
    p["w3"] = jnp.transpose(w3, (2, 1, 0)).astype(jnp.bfloat16)
    p["b1"] = unif(keys[1], (64,), n_leads * 5).reshape(1, -1)
    p["b2"] = unif(keys[3], (128,), 64 * 7).reshape(1, -1)
    p["b3"] = unif(keys[5], (256,), 128 * 9).reshape(1, -1)

    p["emb"] = jax.random.normal(keys[6], (4, condition_dim), jnp.float32)
    p["w_cond"] = unif(keys[7], (50, condition_dim), condition_dim).T  # (cdim, 50)
    p["b_cond"] = unif(keys[8], (50,), condition_dim).reshape(1, -1)

    # flatten dim after the three strided convs (matches _get_flatten_dim)
    l1 = (ecg_length + 2 * 4 - 5) // 2 + 1
    l2 = (l1 + 2 * 3 - 7) // 2 + 1
    l3 = (l2 + 2 * 2 - 9) // 2 + 1
    flat = 256 * l3
    tk = min(HEAD_TK, _round_up(flat, 128))
    flat_pad = _round_up(flat, tk)
    p["l3"], p["flat"], p["flat_pad"], p["head_tk"] = l3, flat, flat_pad, tk

    # MBD + final FC in PyTorch layout, then permute rows to channels-last
    # flatten order and fuse [w_mb | w_x] into one lane-dense weight.
    bnd = (6.0 / (flat + NUM_KERNEL * DIM_KERNEL)) ** 0.5   # xavier_uniform
    w_mb = jax.random.uniform(keys[9], (flat, NUM_KERNEL * DIM_KERNEL),
                              jnp.float32, -bnd, bnd)
    in_fc = flat + NUM_KERNEL + 50
    w_fc = unif(keys[10], (1, in_fc), in_fc)
    b_fc = unif(keys[11], (1,), in_fc)

    n = jnp.arange(flat)
    perm = (n % 256) * l3 + n // 256            # channels-last idx -> PyTorch idx
    w_comb = jnp.zeros((flat_pad, HEAD_NOUT), jnp.float32)
    w_comb = w_comb.at[:flat, :NUM_KERNEL * DIM_KERNEL].set(w_mb[perm])
    w_comb = w_comb.at[:flat, NUM_KERNEL * DIM_KERNEL].set(w_fc[0, :flat][perm])
    p["w_head"] = w_comb.astype(jnp.bfloat16)
    p["w_feat"] = w_fc[:, flat:flat + NUM_KERNEL].T          # (100, 1)
    p["w_cfc"] = w_fc[:, flat + NUM_KERNEL:].T               # (50, 1)
    p["b_fc"] = b_fc.reshape(1, 1)

    # 0/1 group-sum matrix: sums the dim_kernel axis via an in-kernel matmul
    rows = jnp.arange(NUM_KERNEL * DIM_KERNEL)
    g = jnp.zeros((NUM_KERNEL * DIM_KERNEL, NUM_KERNEL), jnp.float32)
    p["group"] = g.at[rows, rows // DIM_KERNEL].set(1.0)
    return p


def critic_forward(params, ecg, condition):
    """ecg: (B, L, n_leads) f32; condition: (B, 1) int32 in [0, 4)."""
    B = ecg.shape[0]

    # conditioning branch: embedding lookup (glue) + Linear (Pallas dense)
    cond_emb = jnp.take(params["emb"], condition[:, 0], axis=0)       # (B, cdim)
    cond = dense(cond_emb, params["w_cond"], params["b_cond"])        # (B, 50)

    # conv stack, channels-last, bf16 activations, LeakyReLU fused in-kernel
    x = ecg.astype(jnp.bfloat16)
    x = conv1d_lrelu(x, params["w1"], params["b1"], pad=4)
    x = conv1d_lrelu(x, params["w2"], params["b2"], pad=3)
    x = conv1d_lrelu(x, params["w3"], params["b3"], pad=2)            # (B, L3, 256)

    # channels-last flatten (head weights were pre-permuted -> no transpose)
    l3, flat = params["l3"], params["flat"]
    flat_pad, tk = params["flat_pad"], params["head_tk"]
    x = x.reshape(B, l3 * 256)
    if flat_pad > flat:
        x = jnp.pad(x, ((0, 0), (0, flat_pad - flat)))

    return mb_discrim_and_fc(x, params["w_head"], params["group"], cond,
                             params["w_feat"], params["w_cfc"],
                             params["b_fc"], tk)


if __name__ == "__main__":
    # Small shapes consistent with the module (ecg_length scaled down).
    ECG_LEN, N_LEADS, COND_DIM, BATCH = 64, 3, 1, 4

    key = jax.random.PRNGKey(0)
    kp, ke, kc = jax.random.split(key, 3)
    params = init_params(kp, ECG_LEN, N_LEADS, COND_DIM)

    ecg = jax.random.normal(ke, (BATCH, ECG_LEN, N_LEADS), jnp.float32)
    condition = jax.random.randint(kc, (BATCH, 1), 0, 4, dtype=jnp.int32)

    out = critic_forward(params, ecg, condition)
    out = jax.block_until_ready(out)
    assert out.shape == (BATCH, 1), out.shape
    assert bool(jnp.all(jnp.isfinite(out)))
    print("KERNEL_OK")
</pallas_src>

<mosaic_0001>
module attributes {stable_mosaic.version = 11 : i64} {
  func.func @_dense_kernel(%arg0: i32, %arg1: memref<4x1xf32, #tpu.memory_space<vmem>>, %arg2: memref<1x50xf32, #tpu.memory_space<vmem>>, %arg3: memref<1x50xf32, #tpu.memory_space<vmem>>, %arg4: memref<4x50xf32, #tpu.memory_space<vmem>>) attributes {dimension_semantics = [#tpu.dimension_semantics<parallel>], iteration_bounds = array<i64: 1>, scalar_prefetch = 0 : i64, scratch_operands = 0 : i64, tpu.core_type = #tpu.core_type<tc>, window_params = [{transform_indices = @transform_0, window_bounds = array<i64: 4, 1>}, {pipeline_mode = #tpu.pipeline_mode<synchronous>, transform_indices = @transform_1, window_bounds = array<i64: 1, 50>}, {pipeline_mode = #tpu.pipeline_mode<synchronous>, transform_indices = @transform_2, window_bounds = array<i64: 1, 50>}, {transform_indices = @transform_3, window_bounds = array<i64: 4, 50>}]} {
    %c0 = arith.constant 0 : index
    %c0_0 = arith.constant 0 : index
    %0 = vector.load %arg1[%c0, %c0_0] : memref<4x1xf32, #tpu.memory_space<vmem>>, vector<4x1xf32>
    %c0_1 = arith.constant 0 : index
    %c0_2 = arith.constant 0 : index
    %1 = vector.load %arg2[%c0_1, %c0_2] : memref<1x50xf32, #tpu.memory_space<vmem>>, vector<1x50xf32>
    %cst = arith.constant dense<0.000000e+00> : vector<4x50xf32>
    %2 = tpu.matmul %0, %1, %cst {dimension_numbers = #tpu.dot_dimension_numbers<[1], [0], [0], [1], [0, 0, 1, 1], [], []>} : vector<4x1xf32>, vector<1x50xf32>, vector<4x50xf32> -> vector<4x50xf32>
    %c0_3 = arith.constant 0 : index
    %c0_4 = arith.constant 0 : index
    %3 = vector.load %arg3[%c0_3, %c0_4] : memref<1x50xf32, #tpu.memory_space<vmem>>, vector<1x50xf32>
    %4 = vector.broadcast %3 : vector<1x50xf32> to vector<4x50xf32>
    %5 = arith.addf %2, %4 : vector<4x50xf32>
    %c0_5 = arith.constant 0 : index
    %c0_6 = arith.constant 0 : index
    %6 = vector.load %arg4[%c0_5, %c0_6] : memref<4x50xf32, #tpu.memory_space<vmem>>, vector<4x50xf32>
    tpu.vector_store %arg4[%c0_5, %c0_6], %5 {strides = array<i32>} : memref<4x50xf32, #tpu.memory_space<vmem>>, vector<4x50xf32>,
    return
  }
  func.func @transform_0(%arg0: i32) -> (i32, i32) {
    %c0_i32 = arith.constant 0 : i32
    %c0_i32_0 = arith.constant 0 : i32
    return %arg0, %c0_i32 : i32, i32
  }
  func.func @transform_1(%arg0: i32) -> (i32, i32) {
    %c0_i32 = arith.constant 0 : i32
    %c0_i32_0 = arith.constant 0 : i32
    %c0_i32_1 = arith.constant 0 : i32
    return %c0_i32, %c0_i32_0 : i32, i32
  }
  func.func @transform_2(%arg0: i32) -> (i32, i32) {
    %c0_i32 = arith.constant 0 : i32
    %c0_i32_0 = arith.constant 0 : i32
    %c0_i32_1 = arith.constant 0 : i32
    return %c0_i32, %c0_i32_0 : i32, i32
  }
  func.func @transform_3(%arg0: i32) -> (i32, i32) {
    %c0_i32 = arith.constant 0 : i32
    %c0_i32_0 = arith.constant 0 : i32
    return %arg0, %c0_i32 : i32, i32
  }
}

</mosaic_0001>

<bundles_post_ra>
// kernel: tpu_custom_call.1
= control target key start
LH: loop header
LB: loop body
LE: loop exit
PB: predicated region body
PF: predicated region fallthrough
CT: control target
= control target key end

     0   :  { %vm28_vm0 = vcmask 1040384   ;;  %vm24_vm1 = vcmask 7168   ;;  %v155_v1 = vmov 0.0   ;;  %vm156_vm2 = vmmov 0   ;;  %s199_s0 = inlined_call_operand.vmem [shape: f32[4,1], index: 0, kind: input, shape index: {}]   ;;  %s200_s1 = inlined_call_operand.vmem [shape: f32[1,50], index: 1, kind: input, shape index: {}]   ;;  %s201_s2 = inlined_call_operand.vmem [shape: f32[1,50], index: 2, kind: input, shape index: {}]   ;;  %s202_s3 = inlined_call_operand.hbm [shape: f32[4,50], index: 3, kind: output, shape index: {}]  }
   0x1   :  { %v16_v0 = vld [vmem:[%s200_s1] sm:$0x1]  ;;  %123 = vmatprep.subr.mxu0 %v155_v1  ;;  %125 = vmatprep.mubr.msk.f32.mxu0 %vm156_vm2, %v155_v1 }
   0x2   :  { %v15_v2 = vld [vmem:[%s199_s0] sm:$0xf] }
   0x3   :  { %8 = vsyncpa [#allocation3], 0  ;;  %124 = vmatpush3.msk.msra.mxu0 %vm28_vm0, %v16_v0  ;;  %v118_v3 = vld [vmem:[%s201_s2] ss:$0 sm:$0xff]  ;;  %s157_s18 = smov [#allocation2]   ;;  %vm102_vm3 = vcmask 404480  }
   0x4   :  { %126 = vmatmul.mubr.msk.f32.vlgmr.msra.gmra.mrb[0].mxu0 %vm24_vm1, %v15_v2  ;;  %s110_s19 = sshll.u32 %s157_s18, 4  ;;  %s111_s19 = int_to_ptr.vmem [resolvable:$true] %s110_s19 }
   0x5   :  { %s131_s1 = scalar_lea.vmem %s111_s19, 64  ;;  %p136_p1 = scmp.lt.s32.totalorder %s111_s19, %s111_s19 }
   0x6   :  { %p132_p0 = scmp.ne.s32.totalorder %s111_s19, %s131_s1  ;;  %p137_p2 = scmp.lt.s32.totalorder %s131_s1, %s131_s1 }
   0x8   :  { %p138_p3 = por %p137_p2, %p136_p1 }
   0xa   :  { %p139_p4 = pnand %p138_p3, %p132_p0 }
  0xd7   :  { %v98_v4 = vpop.f32.mrb[0].mxu0 }
  0xd8   :  { %v99_v5 = vadd.f32 %v118_v3, %v98_v4  ;;  %v127_v6 = vpop.f32.mrb[1].mxu0 }
  0xda   :  { %103 = vst.msk [vmem:[#allocation2] sm:$0xf] %vm102_vm3, %v99_v5 }
  0xdb   :  { %142 = shalt.err (!%p139_p4)
}
  0xdc   :  { %s143_s21 = scalar_lea.hbm %s202_s3, 64 }
  0xdd   :  { %p144_p5 = scmp.ne.s32.totalorder %s202_s3, %s143_s21  ;;  %p147_p6 = scmp.lt.u32.totalorder %s143_s21, %s202_s3 }
  0xdf   :  { %p149_p7 = pnand %p147_p6, %p144_p5 }
  0xe1   :  { %152 = shalt.err (!%p149_p7)
}
  0xe2   :  { %113 = dma.vmem_to_hbm [thread:$0]  %s111_s19, 64, %s202_s3, [#allocation3]  }
  0xe3   :  { %153 = dma.done.wait [#allocation3], 64  }
  0xe4   :  { %154 = vsyncadd [#allocation3], 4294967232 }
  0xe5   :  { %117 = vsyncpa [#allocation3], 1 }

</bundles_post_ra>
